<compile_context>
chip_gen: v6e
topology: v6e:2x2x1
jax: 0.10.0
libtpu: 0.0.40
codegen_flags: <defaults>
</compile_context>

<pallas_src>
import functools
import math

import jax
import jax.numpy as jnp
from jax.experimental import pallas as pl
from jax.experimental.pallas import tpu as pltpu

BN_EPS = 1e-5
LEAKY_SLOPE = 0.01
TILE_M = 1024  # multiple of 128; keeps per-buffer VMEM small even on v7x


# ----------------------------------------------------------------------------
# Pallas kernels
# ----------------------------------------------------------------------------
def _conv_mm_kernel(w_ref, x_ref, shift_ref, o_ref, *, act):
    """out[Cout, M_tile] = act( w[Cout,K] @ patches[K,M_tile] + shift[Cout,1] ).

    w/patches are bf16 (MXU), accumulation + epilogue in f32 (v5e-safe)."""
    y = jnp.dot(w_ref[...], x_ref[...], preferred_element_type=jnp.float32)
    y = y + shift_ref[...]
    if act == "leaky_relu":
        y = jnp.where(y >= 0.0, y, LEAKY_SLOPE * y)
    elif act == "sigmoid":
        y = jax.nn.sigmoid(y)
    o_ref[...] = y.astype(o_ref.dtype)


def conv_matmul(w, shift, patches, act, *, out_dtype=jnp.float32):
    """Lane-dense, M-tiled fused conv matmul.  M = N*Ho*Wo lives on lanes."""
    Cout, K = w.shape
    K2, M = patches.shape
    assert K == K2
    w = w.astype(jnp.bfloat16)
    patches = patches.astype(jnp.bfloat16)
    shift2 = shift.reshape(Cout, 1).astype(jnp.float32)

    tm = M if M <= TILE_M else TILE_M
    grid_m = pl.cdiv(M, tm)

    return pl.pallas_call(
        functools.partial(_conv_mm_kernel, act=act),
        out_shape=jax.ShapeDtypeStruct((Cout, M), out_dtype),
        grid=(grid_m,),
        in_specs=[
            pl.BlockSpec((Cout, K), lambda i: (0, 0)),   # weight resident
            pl.BlockSpec((K, tm), lambda i: (0, i)),     # patches tile (M on lanes)
            pl.BlockSpec((Cout, 1), lambda i: (0, 0)),   # folded bias+BN shift
        ],
        out_specs=pl.BlockSpec((Cout, tm), lambda i: (0, i)),
        compiler_params=pltpu.CompilerParams(dimension_semantics=("parallel",)),
    )(w, patches, shift2)


def _ffn_chain_kernel(*args, n_enc, n_dec, latent_dim):
    """Fused: enc-FFN -> concat(mean|logvar) -> reparameterize -> dec-FFN."""
    n_in = 2 + 2 * (n_enc + 1 + n_dec)
    in_refs = args[:n_in]
    zmean_ref, zlogvar_ref, z_ref, dec_ref = args[n_in:]
    x_ref, eps_ref = in_refs[0], in_refs[1]
    wrefs = in_refs[2:]

    h = x_ref[...]
    idx = 0
    for _ in range(n_enc):
        w = wrefs[idx][...]
        sh = wrefs[idx + 1][...]
        idx += 2
        h = jnp.dot(h, w, preferred_element_type=jnp.float32) + sh
        h = jnp.where(h >= 0.0, h, LEAKY_SLOPE * h)

    w_ml = wrefs[idx][...]
    b_ml = wrefs[idx + 1][...]
    idx += 2
    ml = jnp.dot(h, w_ml, preferred_element_type=jnp.float32) + b_ml
    z_mean = ml[:, :latent_dim]
    z_log_var = ml[:, latent_dim:]
    z = jnp.exp(0.5 * z_log_var) * eps_ref[...] + z_mean

    y = z
    for _ in range(n_dec):
        w = wrefs[idx][...]
        sh = wrefs[idx + 1][...]
        idx += 2
        y = jnp.dot(y, w, preferred_element_type=jnp.float32) + sh
        y = jnp.where(y >= 0.0, y, LEAKY_SLOPE * y)

    zmean_ref[...] = z_mean
    zlogvar_ref[...] = z_log_var
    z_ref[...] = z
    dec_ref[...] = y


def ffn_chain(params, x, eps):
    """Run the full FFN chain in one pallas_call. All tensors are tiny here."""
    B = x.shape[0]
    latent = eps.shape[1]
    enc, dec, ml = params["ffn_enc"], params["ffn_dec"], params["ffn_ml"]

    inputs = [x.astype(jnp.float32), eps.astype(jnp.float32)]
    for layer in enc:
        inputs += [layer["w"], layer["shift"].reshape(1, -1)]
    inputs += [ml["w"], ml["b"].reshape(1, -1)]
    for layer in dec:
        inputs += [layer["w"], layer["shift"].reshape(1, -1)]

    out_flat = dec[-1]["w"].shape[1]
    out_shapes = (
        jax.ShapeDtypeStruct((B, latent), jnp.float32),
        jax.ShapeDtypeStruct((B, latent), jnp.float32),
        jax.ShapeDtypeStruct((B, latent), jnp.float32),
        jax.ShapeDtypeStruct((B, out_flat), jnp.float32),
    )
    in_specs = [pl.BlockSpec(a.shape, lambda i: (0, 0)) for a in inputs]
    out_specs = [pl.BlockSpec(s.shape, lambda i: (0, 0)) for s in out_shapes]

    return pl.pallas_call(
        functools.partial(_ffn_chain_kernel, n_enc=len(enc), n_dec=len(dec),
                          latent_dim=latent),
        out_shape=out_shapes,
        grid=(1,),
        in_specs=in_specs,
        out_specs=out_specs,
    )(*inputs)


# ----------------------------------------------------------------------------
# JAX glue: channel-major im2col, dilation for ConvTranspose
# ----------------------------------------------------------------------------
def im2col_cnhw(x_cnhw, k, stride, pad):
    """Patches from a (C, N, H, W) tensor -> (C*k*k, N*Ho*Wo), K ordered (c,kh,kw)."""
    C, N, H, W = x_cnhw.shape
    if pad:
        x_cnhw = jnp.pad(x_cnhw, ((0, 0), (0, 0), (pad, pad), (pad, pad)))
    Ho = (H + 2 * pad - k) // stride + 1
    Wo = (W + 2 * pad - k) // stride + 1
    cols = []
    for di in range(k):
        for dj in range(k):
            cols.append(
                x_cnhw[:, :, di:di + stride * Ho:stride, dj:dj + stride * Wo:stride]
            )
    patches = jnp.stack(cols, axis=1)                   # (C, k*k, N, Ho, Wo)
    patches = patches.reshape(C * k * k, N * Ho * Wo)   # K on sublanes, M on lanes
    return patches, (N, Ho, Wo)


def dilate_and_pad_cnhw(x_cnhw, stride, k, pad, output_padding):
    """Turn stride-s ConvTranspose2d into a stride-1 conv on a dilated input."""
    C, N, H, W = x_cnhw.shape
    Hd = (H - 1) * stride + 1
    Wd = (W - 1) * stride + 1
    d = jnp.zeros((C, N, Hd, Wd), x_cnhw.dtype)
    d = d.at[:, :, ::stride, ::stride].set(x_cnhw)
    lp = k - 1 - pad
    rp = k - 1 - pad + output_padding
    return jnp.pad(d, ((0, 0), (0, 0), (lp, rp), (lp, rp)))


# ----------------------------------------------------------------------------
# Parameter construction (deterministic, matches the PyTorch module's shapes)
# ----------------------------------------------------------------------------
def make_params(input_size, latent_dim, conv_channels, ffn_layers, key):
    N, C, H, W = input_size
    keys = iter(jax.random.split(key, 64))
    # eval-BN with running_mean=0, running_var=1, gamma=1, beta=0:
    #   y = x / sqrt(1 + eps)   -> fold the scale into the weights once here.
    bn_scale = 1.0 / math.sqrt(1.0 + BN_EPS)

    def kaiming(k, shape, fan_in):
        return jax.random.normal(k, shape, jnp.float32) * math.sqrt(2.0 / fan_in)

    def xavier(k, shape, fan_in, fan_out):
        return jax.random.normal(k, shape, jnp.float32) * math.sqrt(2.0 / (fan_in + fan_out))

    params = {}

    # encoder conv stack: Conv2d(k=3, s=2, p=1) + BN2d + LeakyReLU (folded)
    conv = []
    ch, hw = C, H
    for cc in conv_channels:
        w = kaiming(next(keys), (cc, ch, 3, 3), ch * 9)           # (Cout,Cin,kh,kw)
        w_mat = (w.reshape(cc, ch * 9) * bn_scale).astype(jnp.bfloat16)
        conv.append({"w": w_mat, "shift": jnp.zeros((cc,), jnp.float32)})
        ch = cc
        hw = (hw + 2 - 3) // 2 + 1
    params["conv"] = conv
    conv_size = (ch, hw, hw)               # static (C, H, W) after encoder convs
    flat_size = ch * hw * hw

    # encoder FFN: Linear + BN1d + LeakyReLU (folded, f32 for the fused chain)
    ffn_enc = []
    layer_size = flat_size
    for ls in ffn_layers:
        w = xavier(next(keys), (layer_size, ls), layer_size, ls) * bn_scale
        ffn_enc.append({"w": w, "shift": jnp.zeros((ls,), jnp.float32)})
        layer_size = ls
    params["ffn_enc"] = ffn_enc

    # mean | logvar heads concatenated into one (K, 2*latent) matmul (no BN)
    w_mean = xavier(next(keys), (layer_size, latent_dim), layer_size, latent_dim)
    w_lv = xavier(next(keys), (layer_size, latent_dim), layer_size, latent_dim)
    params["ffn_ml"] = {"w": jnp.concatenate([w_mean, w_lv], axis=1),
                        "b": jnp.zeros((2 * latent_dim,), jnp.float32)}

    # decoder FFN: latent -> reversed(ffn_layers) + [flat_size]
    dec_sizes = list(reversed(ffn_layers)) + [flat_size]
    ffn_dec = []
    layer_size = latent_dim
    for ls in dec_sizes:
        w = xavier(next(keys), (layer_size, ls), layer_size, ls) * bn_scale
        ffn_dec.append({"w": w, "shift": jnp.zeros((ls,), jnp.float32)})
        layer_size = ls
    params["ffn_dec"] = ffn_dec

    # decoder deconv stack: ConvTranspose2d(k=3, s=2, p=1, op=1) + BN2d + act
    # lowered to stride-1 conv weight (Cout, Cin*9): spatial flip + channel swap
    dchannels = list(reversed(conv_channels[:-1])) + [C]
    deconv = []
    ch = conv_channels[-1]
    for cc in dchannels:
        w = kaiming(next(keys), (ch, cc, 3, 3), ch * 9)           # (Cin,Cout,kh,kw)
        w_flip = w[:, :, ::-1, ::-1]
        w_mat = (jnp.transpose(w_flip, (1, 0, 2, 3)).reshape(cc, ch * 9)
                 * bn_scale).astype(jnp.bfloat16)
        deconv.append({"w": w_mat, "shift": jnp.zeros((cc,), jnp.float32)})
        ch = cc
    params["deconv"] = deconv
    return params, conv_size


# ----------------------------------------------------------------------------
# Forward pass (conv_size is STATIC — bound via functools.partial, not traced)
# ----------------------------------------------------------------------------
def vae_forward(params, x_nchw, eps, *, conv_size):
    N = x_nchw.shape[0]
    cC, cH, cW = conv_size

    # ---- encoder convs, channel-major layout, lane-dense fused matmuls ----
    h = jnp.transpose(x_nchw, (1, 0, 2, 3))              # NCHW -> (C, N, H, W)
    for layer in params["conv"]:
        patches, (n, ho, wo) = im2col_cnhw(h, k=3, stride=2, pad=1)
        out = conv_matmul(layer["w"], layer["shift"], patches,
                          "leaky_relu", out_dtype=jnp.bfloat16)
        h = out.reshape(-1, n, ho, wo)                   # (Cout, N, Ho, Wo)

    # flatten in PyTorch (N, C*H*W) order
    flat = jnp.transpose(h, (1, 0, 2, 3)).reshape(N, -1)

    # ---- fused FFN chain: enc FFN -> mean/logvar -> reparam -> dec FFN ----
    z_mean, z_log_var, z, y = ffn_chain(params, flat, eps)

    # PyTorch .view(-1, C, H, W), then back to channel-major for the deconvs
    y = y.reshape(N, cC, cH, cW)
    h = jnp.transpose(y, (1, 0, 2, 3))                   # (C, N, H, W)

    # ---- decoder deconvs (dilate + im2col + lane-dense fused matmul) ----
    n_dec = len(params["deconv"])
    for i, layer in enumerate(params["deconv"]):
        d = dilate_and_pad_cnhw(h, stride=2, k=3, pad=1, output_padding=1)
        patches, (n, ho, wo) = im2col_cnhw(d, k=3, stride=1, pad=0)
        last = i == n_dec - 1
        out = conv_matmul(layer["w"], layer["shift"], patches,
                          "sigmoid" if last else "leaky_relu",
                          out_dtype=jnp.float32 if last else jnp.bfloat16)
        h = out.reshape(-1, n, ho, wo)

    recon = jnp.transpose(h, (1, 0, 2, 3))               # (C,N,H,W) -> NCHW
    return recon, z, z_mean, z_log_var


# ----------------------------------------------------------------------------
if __name__ == "__main__":
    # small config consistent with the module's constructor
    input_size = [2, 4, 16, 16]          # N, C, H, W
    latent_dim = 16
    conv_channels = [8, 16]
    ffn_layers = [32]

    key = jax.random.PRNGKey(0)
    kp, kx, ke = jax.random.split(key, 3)

    params, conv_size = make_params(input_size, latent_dim, conv_channels,
                                    ffn_layers, kp)
    x = jax.random.uniform(kx, tuple(input_size), jnp.float32)
    eps = jax.random.normal(ke, (input_size[0], latent_dim), jnp.float32)

    fwd = jax.jit(functools.partial(vae_forward, conv_size=conv_size))
    recon, z, z_mean, z_log_var = fwd(params, x, eps)
    jax.block_until_ready((recon, z, z_mean, z_log_var))

    assert recon.shape == tuple(input_size), recon.shape
    assert z.shape == (input_size[0], latent_dim)
    assert z_mean.shape == (input_size[0], latent_dim)
    assert z_log_var.shape == (input_size[0], latent_dim)
    assert bool(jnp.all(jnp.isfinite(recon)))
    assert bool(jnp.all(jnp.isfinite(z)))
    print("KERNEL_OK")
</pallas_src>

<mosaic_0001>
module attributes {stable_mosaic.version = 11 : i64} {
  func.func @_conv_mm_kernel(%arg0: i32, %arg1: memref<8x36xbf16, #tpu.memory_space<vmem>>, %arg2: memref<36x128xbf16, #tpu.memory_space<vmem>>, %arg3: memref<8x1xf32, #tpu.memory_space<vmem>>, %arg4: memref<8x128xbf16, #tpu.memory_space<vmem>>) attributes {dimension_semantics = [#tpu.dimension_semantics<parallel>], iteration_bounds = array<i64: 1>, scalar_prefetch = 0 : i64, scratch_operands = 0 : i64, tpu.core_type = #tpu.core_type<tc>, window_params = [{pipeline_mode = #tpu.pipeline_mode<synchronous>, transform_indices = @transform_0, window_bounds = array<i64: 8, 36>}, {transform_indices = @transform_1, window_bounds = array<i64: 36, 128>}, {pipeline_mode = #tpu.pipeline_mode<synchronous>, transform_indices = @transform_2, window_bounds = array<i64: 8, 1>}, {transform_indices = @transform_3, window_bounds = array<i64: 8, 128>}]} {
    %c0 = arith.constant 0 : index
    %c0_0 = arith.constant 0 : index
    %0 = vector.load %arg1[%c0, %c0_0] : memref<8x36xbf16, #tpu.memory_space<vmem>>, vector<8x36xbf16>
    %c0_1 = arith.constant 0 : index
    %c0_2 = arith.constant 0 : index
    %1 = vector.load %arg2[%c0_1, %c0_2] : memref<36x128xbf16, #tpu.memory_space<vmem>>, vector<36x128xbf16>
    %cst = arith.constant dense<0.000000e+00> : vector<8x128xf32>
    %2 = tpu.matmul %0, %1, %cst {dimension_numbers = #tpu.dot_dimension_numbers<[1], [0], [0], [1], [0, 0, 1, 1], [], []>} : vector<8x36xbf16>, vector<36x128xbf16>, vector<8x128xf32> -> vector<8x128xf32>
    %c0_3 = arith.constant 0 : index
    %c0_4 = arith.constant 0 : index
    %3 = vector.load %arg3[%c0_3, %c0_4] : memref<8x1xf32, #tpu.memory_space<vmem>>, vector<8x1xf32>
    %4 = vector.broadcast %3 : vector<8x1xf32> to vector<8x128xf32>
    %5 = arith.addf %2, %4 : vector<8x128xf32>
    %cst_5 = arith.constant 0.000000e+00 : f32
    %6 = vector.broadcast %cst_5 : f32 to vector<8x128xf32>
    %7 = arith.cmpf oge, %5, %6 : vector<8x128xf32>
    %cst_6 = arith.constant 0.00999999977 : f32
    %8 = vector.broadcast %cst_6 : f32 to vector<8x128xf32>
    %9 = arith.mulf %8, %5 : vector<8x128xf32>
    %10 = arith.select %7, %5, %9 : vector<8x128xi1>, vector<8x128xf32>
    %11 = arith.truncf %10 : vector<8x128xf32> to vector<8x128xbf16>
    %c0_7 = arith.constant 0 : index
    %c0_8 = arith.constant 0 : index
    %12 = vector.load %arg4[%c0_7, %c0_8] : memref<8x128xbf16, #tpu.memory_space<vmem>>, vector<8x128xbf16>
    tpu.vector_store %arg4[%c0_7, %c0_8], %11 {strides = array<i32>} : memref<8x128xbf16, #tpu.memory_space<vmem>>, vector<8x128xbf16>,
    return
  }
  func.func @transform_0(%arg0: i32) -> (i32, i32) {
    %c0_i32 = arith.constant 0 : i32
    %c0_i32_0 = arith.constant 0 : i32
    %c0_i32_1 = arith.constant 0 : i32
    return %c0_i32, %c0_i32_0 : i32, i32
  }
  func.func @transform_1(%arg0: i32) -> (i32, i32) {
    %c0_i32 = arith.constant 0 : i32
    %c0_i32_0 = arith.constant 0 : i32
    return %c0_i32, %arg0 : i32, i32
  }
  func.func @transform_2(%arg0: i32) -> (i32, i32) {
    %c0_i32 = arith.constant 0 : i32
    %c0_i32_0 = arith.constant 0 : i32
    %c0_i32_1 = arith.constant 0 : i32
    return %c0_i32, %c0_i32_0 : i32, i32
  }
  func.func @transform_3(%arg0: i32) -> (i32, i32) {
    %c0_i32 = arith.constant 0 : i32
    %c0_i32_0 = arith.constant 0 : i32
    return %c0_i32, %arg0 : i32, i32
  }
}

module attributes {stable_mosaic.version = 11 : i64} {
  func.func @_conv_mm_kernel(%arg0: i32, %arg1: memref<16x72xbf16, #tpu.memory_space<vmem>>, %arg2: memref<72x32xbf16, #tpu.memory_space<vmem>>, %arg3: memref<16x1xf32, #tpu.memory_space<vmem>>, %arg4: memref<16x32xbf16, #tpu.memory_space<vmem>>) attributes {dimension_semantics = [#tpu.dimension_semantics<parallel>], iteration_bounds = array<i64: 1>, scalar_prefetch = 0 : i64, scratch_operands = 0 : i64, tpu.core_type = #tpu.core_type<tc>, window_params = [{pipeline_mode = #tpu.pipeline_mode<synchronous>, transform_indices = @transform_0, window_bounds = array<i64: 16, 72>}, {transform_indices = @transform_1, window_bounds = array<i64: 72, 32>}, {pipeline_mode = #tpu.pipeline_mode<synchronous>, transform_indices = @transform_2, window_bounds = array<i64: 16, 1>}, {transform_indices = @transform_3, window_bounds = array<i64: 16, 32>}]} {
    %c0 = arith.constant 0 : index
    %c0_0 = arith.constant 0 : index
    %0 = vector.load %arg1[%c0, %c0_0] : memref<16x72xbf16, #tpu.memory_space<vmem>>, vector<16x72xbf16>
    %c0_1 = arith.constant 0 : index
    %c0_2 = arith.constant 0 : index
    %1 = vector.load %arg2[%c0_1, %c0_2] : memref<72x32xbf16, #tpu.memory_space<vmem>>, vector<72x32xbf16>
    %cst = arith.constant dense<0.000000e+00> : vector<16x32xf32>
    %2 = tpu.matmul %0, %1, %cst {dimension_numbers = #tpu.dot_dimension_numbers<[1], [0], [0], [1], [0, 0, 1, 1], [], []>} : vector<16x72xbf16>, vector<72x32xbf16>, vector<16x32xf32> -> vector<16x32xf32>
    %c0_3 = arith.constant 0 : index
    %c0_4 = arith.constant 0 : index
    %3 = vector.load %arg3[%c0_3, %c0_4] : memref<16x1xf32, #tpu.memory_space<vmem>>, vector<16x1xf32>
    %4 = vector.broadcast %3 : vector<16x1xf32> to vector<16x32xf32>
    %5 = arith.addf %2, %4 : vector<16x32xf32>
    %cst_5 = arith.constant 0.000000e+00 : f32
    %6 = vector.broadcast %cst_5 : f32 to vector<16x32xf32>
    %7 = arith.cmpf oge, %5, %6 : vector<16x32xf32>
    %cst_6 = arith.constant 0.00999999977 : f32
    %8 = vector.broadcast %cst_6 : f32 to vector<16x32xf32>
    %9 = arith.mulf %8, %5 : vector<16x32xf32>
    %10 = arith.select %7, %5, %9 : vector<16x32xi1>, vector<16x32xf32>
    %11 = arith.truncf %10 : vector<16x32xf32> to vector<16x32xbf16>
    %c0_7 = arith.constant 0 : index
    %c0_8 = arith.constant 0 : index
    %12 = vector.load %arg4[%c0_7, %c0_8] : memref<16x32xbf16, #tpu.memory_space<vmem>>, vector<16x32xbf16>
    tpu.vector_store %arg4[%c0_7, %c0_8], %11 {strides = array<i32>} : memref<16x32xbf16, #tpu.memory_space<vmem>>, vector<16x32xbf16>,
    return
  }
  func.func @transform_0(%arg0: i32) -> (i32, i32) {
    %c0_i32 = arith.constant 0 : i32
    %c0_i32_0 = arith.constant 0 : i32
    %c0_i32_1 = arith.constant 0 : i32
    return %c0_i32, %c0_i32_0 : i32, i32
  }
  func.func @transform_1(%arg0: i32) -> (i32, i32) {
    %c0_i32 = arith.constant 0 : i32
    %c0_i32_0 = arith.constant 0 : i32
    return %c0_i32, %arg0 : i32, i32
  }
  func.func @transform_2(%arg0: i32) -> (i32, i32) {
    %c0_i32 = arith.constant 0 : i32
    %c0_i32_0 = arith.constant 0 : i32
    %c0_i32_1 = arith.constant 0 : i32
    return %c0_i32, %c0_i32_0 : i32, i32
  }
  func.func @transform_3(%arg0: i32) -> (i32, i32) {
    %c0_i32 = arith.constant 0 : i32
    %c0_i32_0 = arith.constant 0 : i32
    return %c0_i32, %arg0 : i32, i32
  }
}

module attributes {stable_mosaic.version = 11 : i64} {
  func.func @_ffn_chain_kernel(%arg0: i32, %arg1: memref<2x256xf32, #tpu.memory_space<vmem>>, %arg2: memref<2x16xf32, #tpu.memory_space<vmem>>, %arg3: memref<256x32xf32, #tpu.memory_space<vmem>>, %arg4: memref<1x32xf32, #tpu.memory_space<vmem>>, %arg5: memref<32x32xf32, #tpu.memory_space<vmem>>, %arg6: memref<1x32xf32, #tpu.memory_space<vmem>>, %arg7: memref<16x32xf32, #tpu.memory_space<vmem>>, %arg8: memref<1x32xf32, #tpu.memory_space<vmem>>, %arg9: memref<32x256xf32, #tpu.memory_space<vmem>>, %arg10: memref<1x256xf32, #tpu.memory_space<vmem>>, %arg11: memref<2x16xf32, #tpu.memory_space<vmem>>, %arg12: memref<2x16xf32, #tpu.memory_space<vmem>>, %arg13: memref<2x16xf32, #tpu.memory_space<vmem>>, %arg14: memref<2x256xf32, #tpu.memory_space<vmem>>) attributes {dimension_semantics = [#tpu.dimension_semantics<arbitrary>], iteration_bounds = array<i64: 1>, scalar_prefetch = 0 : i64, scratch_operands = 0 : i64, tpu.core_type = #tpu.core_type<tc>, window_params = [{pipeline_mode = #tpu.pipeline_mode<synchronous>, transform_indices = @transform_0, window_bounds = array<i64: 2, 256>}, {pipeline_mode = #tpu.pipeline_mode<synchronous>, transform_indices = @transform_1, window_bounds = array<i64: 2, 16>}, {pipeline_mode = #tpu.pipeline_mode<synchronous>, transform_indices = @transform_2, window_bounds = array<i64: 256, 32>}, {pipeline_mode = #tpu.pipeline_mode<synchronous>, transform_indices = @transform_3, window_bounds = array<i64: 1, 32>}, {pipeline_mode = #tpu.pipeline_mode<synchronous>, transform_indices = @transform_4, window_bounds = array<i64: 32, 32>}, {pipeline_mode = #tpu.pipeline_mode<synchronous>, transform_indices = @transform_5, window_bounds = array<i64: 1, 32>}, {pipeline_mode = #tpu.pipeline_mode<synchronous>, transform_indices = @transform_6, window_bounds = array<i64: 16, 32>}, {pipeline_mode = #tpu.pipeline_mode<synchronous>, transform_indices = @transform_7, window_bounds = array<i64: 1, 32>}, {pipeline_mode = #tpu.pipeline_mode<synchronous>, transform_indices = @transform_8, window_bounds = array<i64: 32, 256>}, {pipeline_mode = #tpu.pipeline_mode<synchronous>, transform_indices = @transform_9, window_bounds = array<i64: 1, 256>}, {pipeline_mode = #tpu.pipeline_mode<synchronous>, transform_indices = @transform_10, window_bounds = array<i64: 2, 16>}, {pipeline_mode = #tpu.pipeline_mode<synchronous>, transform_indices = @transform_11, window_bounds = array<i64: 2, 16>}, {pipeline_mode = #tpu.pipeline_mode<synchronous>, transform_indices = @transform_12, window_bounds = array<i64: 2, 16>}, {pipeline_mode = #tpu.pipeline_mode<synchronous>, transform_indices = @transform_13, window_bounds = array<i64: 2, 256>}]} {
    %c0 = arith.constant 0 : index
    %c0_0 = arith.constant 0 : index
    %0 = vector.load %arg1[%c0, %c0_0] : memref<2x256xf32, #tpu.memory_space<vmem>>, vector<2x256xf32>
    %c0_1 = arith.constant 0 : index
    %c0_2 = arith.constant 0 : index
    %1 = vector.load %arg3[%c0_1, %c0_2] : memref<256x32xf32, #tpu.memory_space<vmem>>, vector<256x32xf32>
    %c0_3 = arith.constant 0 : index
    %c0_4 = arith.constant 0 : index
    %2 = vector.load %arg4[%c0_3, %c0_4] : memref<1x32xf32, #tpu.memory_space<vmem>>, vector<1x32xf32>
    %cst = arith.constant dense<0.000000e+00> : vector<2x32xf32>
    %3 = tpu.matmul %0, %1, %cst {dimension_numbers = #tpu.dot_dimension_numbers<[1], [0], [0], [1], [0, 0, 1, 1], [], []>} : vector<2x256xf32>, vector<256x32xf32>, vector<2x32xf32> -> vector<2x32xf32>
    %4 = vector.broadcast %2 : vector<1x32xf32> to vector<2x32xf32>
    %5 = arith.addf %3, %4 : vector<2x32xf32>
    %cst_5 = arith.constant 0.000000e+00 : f32
    %6 = vector.broadcast %cst_5 : f32 to vector<2x32xf32>
    %7 = arith.cmpf oge, %5, %6 : vector<2x32xf32>
    %cst_6 = arith.constant 0.00999999977 : f32
    %8 = vector.broadcast %cst_6 : f32 to vector<2x32xf32>
    %9 = arith.mulf %8, %5 : vector<2x32xf32>
    %10 = arith.select %7, %5, %9 : vector<2x32xi1>, vector<2x32xf32>
    %c0_7 = arith.constant 0 : index
    %c0_8 = arith.constant 0 : index
    %11 = vector.load %arg5[%c0_7, %c0_8] : memref<32x32xf32, #tpu.memory_space<vmem>>, vector<32x32xf32>
    %c0_9 = arith.constant 0 : index
    %c0_10 = arith.constant 0 : index
    %12 = vector.load %arg6[%c0_9, %c0_10] : memref<1x32xf32, #tpu.memory_space<vmem>>, vector<1x32xf32>
    %cst_11 = arith.constant dense<0.000000e+00> : vector<2x32xf32>
    %13 = tpu.matmul %10, %11, %cst_11 {dimension_numbers = #tpu.dot_dimension_numbers<[1], [0], [0], [1], [0, 0, 1, 1], [], []>} : vector<2x32xf32>, vector<32x32xf32>, vector<2x32xf32> -> vector<2x32xf32>
    %14 = vector.broadcast %12 : vector<1x32xf32> to vector<2x32xf32>
    %15 = arith.addf %13, %14 : vector<2x32xf32>
    %16 = vector.extract_strided_slice %15 {offsets = [0, 0], sizes = [2, 16], strides = [1, 1]} : vector<2x32xf32> to vector<2x16xf32>
    %17 = vector.extract_strided_slice %15 {offsets = [0, 16], sizes = [2, 16], strides = [1, 1]} : vector<2x32xf32> to vector<2x16xf32>
    %cst_12 = arith.constant 5.000000e-01 : f32
    %18 = vector.broadcast %cst_12 : f32 to vector<2x16xf32>
    %19 = arith.mulf %18, %17 : vector<2x16xf32>
    %20 = math.exp %19 : vector<2x16xf32>
    %c0_13 = arith.constant 0 : index
    %c0_14 = arith.constant 0 : index
    %21 = vector.load %arg2[%c0_13, %c0_14] : memref<2x16xf32, #tpu.memory_space<vmem>>, vector<2x16xf32>
    %22 = arith.mulf %20, %21 : vector<2x16xf32>
    %23 = arith.addf %22, %16 : vector<2x16xf32>
    %c0_15 = arith.constant 0 : index
    %c0_16 = arith.constant 0 : index
    %24 = vector.load %arg7[%c0_15, %c0_16] : memref<16x32xf32, #tpu.memory_space<vmem>>, vector<16x32xf32>
    %c0_17 = arith.constant 0 : index
    %c0_18 = arith.constant 0 : index
    %25 = vector.load %arg8[%c0_17, %c0_18] : memref<1x32xf32, #tpu.memory_space<vmem>>, vector<1x32xf32>
    %cst_19 = arith.constant dense<0.000000e+00> : vector<2x32xf32>
    %26 = tpu.matmul %23, %24, %cst_19 {dimension_numbers = #tpu.dot_dimension_numbers<[1], [0], [0], [1], [0, 0, 1, 1], [], []>} : vector<2x16xf32>, vector<16x32xf32>, vector<2x32xf32> -> vector<2x32xf32>
    %27 = vector.broadcast %25 : vector<1x32xf32> to vector<2x32xf32>
    %28 = arith.addf %26, %27 : vector<2x32xf32>
    %cst_20 = arith.constant 0.000000e+00 : f32
    %29 = vector.broadcast %cst_20 : f32 to vector<2x32xf32>
    %30 = arith.cmpf oge, %28, %29 : vector<2x32xf32>
    %cst_21 = arith.constant 0.00999999977 : f32
    %31 = vector.broadcast %cst_21 : f32 to vector<2x32xf32>
    %32 = arith.mulf %31, %28 : vector<2x32xf32>
    %33 = arith.select %30, %28, %32 : vector<2x32xi1>, vector<2x32xf32>
    %c0_22 = arith.constant 0 : index
    %c0_23 = arith.constant 0 : index
    %34 = vector.load %arg9[%c0_22, %c0_23] : memref<32x256xf32, #tpu.memory_space<vmem>>, vector<32x256xf32>
    %c0_24 = arith.constant 0 : index
    %c0_25 = arith.constant 0 : index
    %35 = vector.load %arg10[%c0_24, %c0_25] : memref<1x256xf32, #tpu.memory_space<vmem>>, vector<1x256xf32>
    %cst_26 = arith.constant dense<0.000000e+00> : vector<2x256xf32>
    %36 = tpu.matmul %33, %34, %cst_26 {dimension_numbers = #tpu.dot_dimension_numbers<[1], [0], [0], [1], [0, 0, 1, 1], [], []>} : vector<2x32xf32>, vector<32x256xf32>, vector<2x256xf32> -> vector<2x256xf32>
    %37 = vector.broadcast %35 : vector<1x256xf32> to vector<2x256xf32>
    %38 = arith.addf %36, %37 : vector<2x256xf32>
    %cst_27 = arith.constant 0.000000e+00 : f32
    %39 = vector.broadcast %cst_27 : f32 to vector<2x256xf32>
    %40 = arith.cmpf oge, %38, %39 : vector<2x256xf32>
    %cst_28 = arith.constant 0.00999999977 : f32
    %41 = vector.broadcast %cst_28 : f32 to vector<2x256xf32>
    %42 = arith.mulf %41, %38 : vector<2x256xf32>
    %43 = arith.select %40, %38, %42 : vector<2x256xi1>, vector<2x256xf32>
    %c0_29 = arith.constant 0 : index
    %c0_30 = arith.constant 0 : index
    %44 = vector.load %arg11[%c0_29, %c0_30] : memref<2x16xf32, #tpu.memory_space<vmem>>, vector<2x16xf32>
    tpu.vector_store %arg11[%c0_29, %c0_30], %16 {strides = array<i32>} : memref<2x16xf32, #tpu.memory_space<vmem>>, vector<2x16xf32>,
    %c0_31 = arith.constant 0 : index
    %c0_32 = arith.constant 0 : index
    %45 = vector.load %arg12[%c0_31, %c0_32] : memref<2x16xf32, #tpu.memory_space<vmem>>, vector<2x16xf32>
    tpu.vector_store %arg12[%c0_31, %c0_32], %17 {strides = array<i32>} : memref<2x16xf32, #tpu.memory_space<vmem>>, vector<2x16xf32>,
    %c0_33 = arith.constant 0 : index
    %c0_34 = arith.constant 0 : index
    %46 = vector.load %arg13[%c0_33, %c0_34] : memref<2x16xf32, #tpu.memory_space<vmem>>, vector<2x16xf32>
    tpu.vector_store %arg13[%c0_33, %c0_34], %23 {strides = array<i32>} : memref<2x16xf32, #tpu.memory_space<vmem>>, vector<2x16xf32>,
    %c0_35 = arith.constant 0 : index
    %c0_36 = arith.constant 0 : index
    %47 = vector.load %arg14[%c0_35, %c0_36] : memref<2x256xf32, #tpu.memory_space<vmem>>, vector<2x256xf32>
    tpu.vector_store %arg14[%c0_35, %c0_36], %43 {strides = array<i32>} : memref<2x256xf32, #tpu.memory_space<vmem>>, vector<2x256xf32>,
    return
  }
  func.func @transform_0(%arg0: i32) -> (i32, i32) {
    %c0_i32 = arith.constant 0 : i32
    %c0_i32_0 = arith.constant 0 : i32
    %c0_i32_1 = arith.constant 0 : i32
    return %c0_i32, %c0_i32_0 : i32, i32
  }
  func.func @transform_1(%arg0: i32) -> (i32, i32) {
    %c0_i32 = arith.constant 0 : i32
    %c0_i32_0 = arith.constant 0 : i32
    %c0_i32_1 = arith.constant 0 : i32
    return %c0_i32, %c0_i32_0 : i32, i32
  }
  func.func @transform_2(%arg0: i32) -> (i32, i32) {
    %c0_i32 = arith.constant 0 : i32
    %c0_i32_0 = arith.constant 0 : i32
    %c0_i32_1 = arith.constant 0 : i32
    return %c0_i32, %c0_i32_0 : i32, i32
  }
  func.func @transform_3(%arg0: i32) -> (i32, i32) {
    %c0_i32 = arith.constant 0 : i32
    %c0_i32_0 = arith.constant 0 : i32
    %c0_i32_1 = arith.constant 0 : i32
    return %c0_i32, %c0_i32_0 : i32, i32
  }
  func.func @transform_4(%arg0: i32) -> (i32, i32) {
    %c0_i32 = arith.constant 0 : i32
    %c0_i32_0 = arith.constant 0 : i32
    %c0_i32_1 = arith.constant 0 : i32
    return %c0_i32, %c0_i32_0 : i32, i32
  }
  func.func @transform_5(%arg0: i32) -> (i32, i32) {
    %c0_i32 = arith.constant 0 : i32
    %c0_i32_0 = arith.constant 0 : i32
    %c0_i32_1 = arith.constant 0 : i32
    return %c0_i32, %c0_i32_0 : i32, i32
  }
  func.func @transform_6(%arg0: i32) -> (i32, i32) {
    %c0_i32 = arith.constant 0 : i32
    %c0_i32_0 = arith.constant 0 : i32
    %c0_i32_1 = arith.constant 0 : i32
    return %c0_i32, %c0_i32_0 : i32, i32
  }
  func.func @transform_7(%arg0: i32) -> (i32, i32) {
    %c0_i32 = arith.constant 0 : i32
    %c0_i32_0 = arith.constant 0 : i32
    %c0_i32_1 = arith.constant 0 : i32
    return %c0_i32, %c0_i32_0 : i32, i32
  }
  func.func @transform_8(%arg0: i32) -> (i32, i32) {
    %c0_i32 = arith.constant 0 : i32
    %c0_i32_0 = arith.constant 0 : i32
    %c0_i32_1 = arith.constant 0 : i32
    return %c0_i32, %c0_i32_0 : i32, i32
  }
  func.func @transform_9(%arg0: i32) -> (i32, i32) {
    %c0_i32 = arith.constant 0 : i32
    %c0_i32_0 = arith.constant 0 : i32
    %c0_i32_1 = arith.constant 0 : i32
    return %c0_i32, %c0_i32_0 : i32, i32
  }
  func.func @transform_10(%arg0: i32) -> (i32, i32) {
    %c0_i32 = arith.constant 0 : i32
    %c0_i32_0 = arith.constant 0 : i32
    %c0_i32_1 = arith.constant 0 : i32
    return %c0_i32, %c0_i32_0 : i32, i32
  }
  func.func @transform_11(%arg0: i32) -> (i32, i32) {
    %c0_i32 = arith.constant 0 : i32
    %c0_i32_0 = arith.constant 0 : i32
    %c0_i32_1 = arith.constant 0 : i32
    return %c0_i32, %c0_i32_0 : i32, i32
  }
  func.func @transform_12(%arg0: i32) -> (i32, i32) {
    %c0_i32 = arith.constant 0 : i32
    %c0_i32_0 = arith.constant 0 : i32
    %c0_i32_1 = arith.constant 0 : i32
    return %c0_i32, %c0_i32_0 : i32, i32
  }
  func.func @transform_13(%arg0: i32) -> (i32, i32) {
    %c0_i32 = arith.constant 0 : i32
    %c0_i32_0 = arith.constant 0 : i32
    %c0_i32_1 = arith.constant 0 : i32
    return %c0_i32, %c0_i32_0 : i32, i32
  }
}

module attributes {stable_mosaic.version = 11 : i64} {
  func.func @_conv_mm_kernel(%arg0: i32, %arg1: memref<8x144xbf16, #tpu.memory_space<vmem>>, %arg2: memref<144x128xbf16, #tpu.memory_space<vmem>>, %arg3: memref<8x1xf32, #tpu.memory_space<vmem>>, %arg4: memref<8x128xbf16, #tpu.memory_space<vmem>>) attributes {dimension_semantics = [#tpu.dimension_semantics<parallel>], iteration_bounds = array<i64: 1>, scalar_prefetch = 0 : i64, scratch_operands = 0 : i64, tpu.core_type = #tpu.core_type<tc>, window_params = [{pipeline_mode = #tpu.pipeline_mode<synchronous>, transform_indices = @transform_0, window_bounds = array<i64: 8, 144>}, {transform_indices = @transform_1, window_bounds = array<i64: 144, 128>}, {pipeline_mode = #tpu.pipeline_mode<synchronous>, transform_indices = @transform_2, window_bounds = array<i64: 8, 1>}, {transform_indices = @transform_3, window_bounds = array<i64: 8, 128>}]} {
    %c0 = arith.constant 0 : index
    %c0_0 = arith.constant 0 : index
    %0 = vector.load %arg1[%c0, %c0_0] : memref<8x144xbf16, #tpu.memory_space<vmem>>, vector<8x144xbf16>
    %c0_1 = arith.constant 0 : index
    %c0_2 = arith.constant 0 : index
    %1 = vector.load %arg2[%c0_1, %c0_2] : memref<144x128xbf16, #tpu.memory_space<vmem>>, vector<144x128xbf16>
    %cst = arith.constant dense<0.000000e+00> : vector<8x128xf32>
    %2 = tpu.matmul %0, %1, %cst {dimension_numbers = #tpu.dot_dimension_numbers<[1], [0], [0], [1], [0, 0, 1, 1], [], []>} : vector<8x144xbf16>, vector<144x128xbf16>, vector<8x128xf32> -> vector<8x128xf32>
    %c0_3 = arith.constant 0 : index
    %c0_4 = arith.constant 0 : index
    %3 = vector.load %arg3[%c0_3, %c0_4] : memref<8x1xf32, #tpu.memory_space<vmem>>, vector<8x1xf32>
    %4 = vector.broadcast %3 : vector<8x1xf32> to vector<8x128xf32>
    %5 = arith.addf %2, %4 : vector<8x128xf32>
    %cst_5 = arith.constant 0.000000e+00 : f32
    %6 = vector.broadcast %cst_5 : f32 to vector<8x128xf32>
    %7 = arith.cmpf oge, %5, %6 : vector<8x128xf32>
    %cst_6 = arith.constant 0.00999999977 : f32
    %8 = vector.broadcast %cst_6 : f32 to vector<8x128xf32>
    %9 = arith.mulf %8, %5 : vector<8x128xf32>
    %10 = arith.select %7, %5, %9 : vector<8x128xi1>, vector<8x128xf32>
    %11 = arith.truncf %10 : vector<8x128xf32> to vector<8x128xbf16>
    %c0_7 = arith.constant 0 : index
    %c0_8 = arith.constant 0 : index
    %12 = vector.load %arg4[%c0_7, %c0_8] : memref<8x128xbf16, #tpu.memory_space<vmem>>, vector<8x128xbf16>
    tpu.vector_store %arg4[%c0_7, %c0_8], %11 {strides = array<i32>} : memref<8x128xbf16, #tpu.memory_space<vmem>>, vector<8x128xbf16>,
    return
  }
  func.func @transform_0(%arg0: i32) -> (i32, i32) {
    %c0_i32 = arith.constant 0 : i32
    %c0_i32_0 = arith.constant 0 : i32
    %c0_i32_1 = arith.constant 0 : i32
    return %c0_i32, %c0_i32_0 : i32, i32
  }
  func.func @transform_1(%arg0: i32) -> (i32, i32) {
    %c0_i32 = arith.constant 0 : i32
    %c0_i32_0 = arith.constant 0 : i32
    return %c0_i32, %arg0 : i32, i32
  }
  func.func @transform_2(%arg0: i32) -> (i32, i32) {
    %c0_i32 = arith.constant 0 : i32
    %c0_i32_0 = arith.constant 0 : i32
    %c0_i32_1 = arith.constant 0 : i32
    return %c0_i32, %c0_i32_0 : i32, i32
  }
  func.func @transform_3(%arg0: i32) -> (i32, i32) {
    %c0_i32 = arith.constant 0 : i32
    %c0_i32_0 = arith.constant 0 : i32
    return %c0_i32, %arg0 : i32, i32
  }
}

module attributes {stable_mosaic.version = 11 : i64} {
  func.func @_conv_mm_kernel(%arg0: i32, %arg1: memref<4x72xbf16, #tpu.memory_space<vmem>>, %arg2: memref<72x512xbf16, #tpu.memory_space<vmem>>, %arg3: memref<4x1xf32, #tpu.memory_space<vmem>>, %arg4: memref<4x512xf32, #tpu.memory_space<vmem>>) attributes {dimension_semantics = [#tpu.dimension_semantics<parallel>], iteration_bounds = array<i64: 1>, scalar_prefetch = 0 : i64, scratch_operands = 0 : i64, tpu.core_type = #tpu.core_type<tc>, window_params = [{pipeline_mode = #tpu.pipeline_mode<synchronous>, transform_indices = @transform_0, window_bounds = array<i64: 4, 72>}, {transform_indices = @transform_1, window_bounds = array<i64: 72, 512>}, {pipeline_mode = #tpu.pipeline_mode<synchronous>, transform_indices = @transform_2, window_bounds = array<i64: 4, 1>}, {transform_indices = @transform_3, window_bounds = array<i64: 4, 512>}]} {
    %c0 = arith.constant 0 : index
    %c0_0 = arith.constant 0 : index
    %0 = vector.load %arg1[%c0, %c0_0] : memref<4x72xbf16, #tpu.memory_space<vmem>>, vector<4x72xbf16>
    %c0_1 = arith.constant 0 : index
    %c0_2 = arith.constant 0 : index
    %1 = vector.load %arg2[%c0_1, %c0_2] : memref<72x512xbf16, #tpu.memory_space<vmem>>, vector<72x512xbf16>
    %cst = arith.constant dense<0.000000e+00> : vector<4x512xf32>
    %2 = tpu.matmul %0, %1, %cst {dimension_numbers = #tpu.dot_dimension_numbers<[1], [0], [0], [1], [0, 0, 1, 1], [], []>} : vector<4x72xbf16>, vector<72x512xbf16>, vector<4x512xf32> -> vector<4x512xf32>
    %c0_3 = arith.constant 0 : index
    %c0_4 = arith.constant 0 : index
    %3 = vector.load %arg3[%c0_3, %c0_4] : memref<4x1xf32, #tpu.memory_space<vmem>>, vector<4x1xf32>
    %4 = vector.broadcast %3 : vector<4x1xf32> to vector<4x512xf32>
    %5 = arith.addf %2, %4 : vector<4x512xf32>
    %6 = arith.negf %5 : vector<4x512xf32>
    %7 = math.exp %6 : vector<4x512xf32>
    %cst_5 = arith.constant 1.000000e+00 : f32
    %8 = vector.broadcast %cst_5 : f32 to vector<4x512xf32>
    %9 = arith.addf %8, %7 : vector<4x512xf32>
    %10 = arith.divf %8, %9 : vector<4x512xf32>
    %c0_6 = arith.constant 0 : index
    %c0_7 = arith.constant 0 : index
    %11 = vector.load %arg4[%c0_6, %c0_7] : memref<4x512xf32, #tpu.memory_space<vmem>>, vector<4x512xf32>
    tpu.vector_store %arg4[%c0_6, %c0_7], %10 {strides = array<i32>} : memref<4x512xf32, #tpu.memory_space<vmem>>, vector<4x512xf32>,
    return
  }
  func.func @transform_0(%arg0: i32) -> (i32, i32) {
    %c0_i32 = arith.constant 0 : i32
    %c0_i32_0 = arith.constant 0 : i32
    %c0_i32_1 = arith.constant 0 : i32
    return %c0_i32, %c0_i32_0 : i32, i32
  }
  func.func @transform_1(%arg0: i32) -> (i32, i32) {
    %c0_i32 = arith.constant 0 : i32
    %c0_i32_0 = arith.constant 0 : i32
    return %c0_i32, %arg0 : i32, i32
  }
  func.func @transform_2(%arg0: i32) -> (i32, i32) {
    %c0_i32 = arith.constant 0 : i32
    %c0_i32_0 = arith.constant 0 : i32
    %c0_i32_1 = arith.constant 0 : i32
    return %c0_i32, %c0_i32_0 : i32, i32
  }
  func.func @transform_3(%arg0: i32) -> (i32, i32) {
    %c0_i32 = arith.constant 0 : i32
    %c0_i32_0 = arith.constant 0 : i32
    return %c0_i32, %arg0 : i32, i32
  }
}

</mosaic_0001>

<bundles_post_ra>
// kernel: vae_forward.5
= control target key start
LH: loop header
LB: loop body
LE: loop exit
PB: predicated region body
PF: predicated region fallthrough
CT: control target
= control target key end

     0   :  { %8 = vsyncpa [#allocation3], 0  ;;  %s160_s12 = smov [#allocation2]   ;;  %s202_s0 = inlined_call_operand.hbm [shape: bf16[8,36], index: 0, kind: input, shape index: {}]   ;;  %s203_s1 = inlined_call_operand.vmem [shape: bf16[36,128], index: 1, kind: input, shape index: {}]   ;;  %s204_s2 = inlined_call_operand.vmem [shape: f32[8,1], index: 2, kind: input, shape index: {}]   ;;  %s205_s3 = inlined_call_operand.vmem [shape: bf16[8,128], index: 3, kind: output, shape index: {}]  }
   0x1   :  { %s15_s13 = sshll.u32 %s160_s12, 4  ;;  %s16_s13 = int_to_ptr.vmem [resolvable:$true] %s15_s13 }
   0x2   :  { %s146_s14 = scalar_lea.vmem %s16_s13, 64  ;;  %p151_p1 = scmp.lt.s32.totalorder %s16_s13, %s16_s13 }
   0x3   :  { %p147_p0 = scmp.ne.s32.totalorder %s16_s13, %s146_s14  ;;  %p152_p2 = scmp.lt.s32.totalorder %s146_s14, %s146_s14 }
   0x5   :  { %p153_p3 = por %p152_p2, %p151_p1 }
   0x7   :  { %p154_p4 = pnand %p153_p3, %p147_p0 }
   0x9   :  { %157 = shalt.err (!%p154_p4)
}
   0xa   :  { %18 = dma.hbm_to_vmem [thread:$0]  %s202_s0, 64, %s16_s13, [#allocation3]  }
   0xb   :  { %158 = dma.done.wait [#allocation3], 64  }
   0xc   :  { %159 = vsyncadd [#allocation3], 4294967232  ;;  %v161_v0 = vmov 0.0   ;;  %vm162_vm0 = vmmov 0   ;;  %v163_v1 = vmov 0   ;;  %vm58_vm1 = vcmask 1041408  }
   0xd   :  { %120 = vmatprep.subr.bf16.mxu0 %v161_v0  ;;  %126 = vmatprep.mubr.msk.bf16.mxu0 %vm162_vm0, %v161_v0  ;;  %v135_v2 = vld [vmem:[%s203_s1 + $0x10] ss:$0 sps:$4 sm:$0x33]   ;;  %v136_v4 = vld [vmem:[%s203_s1 + $0x8] sm:$0xff]   ;;  %v33_v5 = vld [vmem:[%s204_s2] sm:$0xff]  ;;  %vm54_vm2 = vcmask 293888  }
   0xe   :  { %134 = vset.pattern.permute.xlu0 %v163_v1  ;;  %v60_v3 = vsel %vm58_vm1, %v135_v2, 0  ;;  %v137_v6 = vld [vmem:[%s203_s1] sm:$0xff]  }
   0xf   :  { %121 = vmatpush3.bf16.msra.mxu0 %v60_v3  ;;  %36 = vperm.xlu0 %134, %v33_v5   ;;  %v27_v7 = vld [vmem:[#allocation2] sm:$0xf] }
  0x10   :  { %122 = vmatprep.subr.bf16.mxu0 %v161_v0 }
  0x13   :  { %123 = vmatpush3.bf16.msra.mxu0 %v136_v4 }
  0x14   :  { %124 = vmatprep.subr.bf16.mxu0 %v161_v0 }
  0x17   :  { %125 = vmatpush3.bf16.msra.mxu0 %v137_v6 }
  0x1a   :  { %127 = vmatmul.mubr.msk.bf16.vlgmr.msra.gmra.mxu0 %vm54_vm2, %v27_v7 }
  0x8a   :  { %v37_v8 = vpop.permute.xlu0 %36 }
  0xda   :  { %v96_v9 = vpop.f32.mrf.mxu0 }
  0xdb   :  { %v97_v10 = vadd.f32 %v96_v9, %v37_v8 }
  0xdc   :  { %v128_v11 = vpop.f32.mrf.mxu0 }
  0xdd   :  { %vm102_vm3 = vcmp.ge.f32.partialorder %v97_v10, 0.0  ;;  %v103_v12 = vmul.f32 0.01, %v97_v10 }
  0xde   :  { %v99_v13 = vpop.f32.mrf.mxu0 }
  0xdf   :  { %v104_v14 = vsel %vm102_vm3, %v97_v10, %v103_v12 }
  0xe0   :  { %v105_v15 = vpack.c.bf16 %v104_v14, %v104_v14  ;;  %v129_v16 = vpop.f32.mrf.mxu0 }
  0xe2   :  { %106 = vst [vmem:[%s205_s3] sm:$0xf] %v105_v15 }
  0xe3   :  { %111 = vsyncpa [#allocation3], 1 }

// kernel: vae_forward.6
= control target key start
LH: loop header
LB: loop body
LE: loop exit
PB: predicated region body
PF: predicated region fallthrough
CT: control target
= control target key end

     0   :  { %vm74_vm0 = vcmask 1043456   ;;  %v181_v0 = vmov 0.0   ;;  %vm182_vm1 = vmmov 0   ;;  %v183_v3 = vmov 0   ;;  %s234_s1 = inlined_call_operand.vmem [shape: bf16[72,32], index: 1, kind: input, shape index: {}]   ;;  %s235_s2 = inlined_call_operand.vmem [shape: f32[16,1], index: 2, kind: input, shape index: {}]   ;;  %s236_s0 = inlined_call_operand.vmem [shape: bf16[16,72], index: 0, kind: input, shape index: {}]   ;;  %s237_s3 = inlined_call_operand.vmem [shape: bf16[16,32], index: 3, kind: output, shape index: {}]  }
   0x1   :  { %157 = vmatprep.subr.bf16.mxu0 %v181_v0  ;;  %v175_v1 = vld [vmem:[%s234_s1 + $0x20] ss:$0 sps:$4 sm:$0xff]   ;;  %167 = vmatprep.mubr.msk.bf16.mxu0 %vm182_vm1, %v181_v0  ;;  %v176_v4 = vld [vmem:[%s234_s1 + $0x18] sm:$0xff]   ;;  %v177_v6 = vld [vmem:[%s234_s1 + $0x10] sm:$0xff]   ;;  %vm70_vm2 = vcmask 588800   ;;  %vm133_vm4 = vcmask 257024  }
   0x2   :  { %v76_v2 = vsel %vm74_vm0, %v175_v1, 0  ;;  %174 = vset.pattern.permute.xlu0 %v183_v3  ;;  %v26_v5 = vld [vmem:[%s235_s2] sm:$0xff]  ;;  %v27_v7 = vld [vmem:[%s235_s2 + $0x8] sm:$0xff] }
   0x3   :  { %158 = vmatpush3.bf16.msra.mxu0 %v76_v2  ;;  %30 = vperm.xlu0 %174, %v26_v5   ;;  %v178_v8 = vld [vmem:[%s234_s1 + $0x8] sm:$0xff]   ;;  %v179_v9 = vld [vmem:[%s234_s1] sm:$0xff]  }
   0x4   :  { %159 = vmatprep.subr.bf16.mxu0 %v181_v0  ;;  %v180_v10 = vld [vmem:[%s236_s0] sm:$0xff]  }
   0x7   :  { %160 = vmatpush3.bf16.msra.mxu0 %v176_v4  ;;  %35 = vperm.xlu0 %174, %v27_v7  }
   0x8   :  { %161 = vmatprep.subr.bf16.mxu0 %v181_v0 }
   0xb   :  { %162 = vmatpush3.bf16.msra.mxu0 %v177_v6 }
   0xc   :  { %163 = vmatprep.subr.bf16.mxu0 %v181_v0 }
   0xf   :  { %164 = vmatpush3.bf16.msra.mxu0 %v178_v8 }
  0x10   :  { %165 = vmatprep.subr.bf16.mxu0 %v181_v0 }
  0x13   :  { %166 = vmatpush3.bf16.msra.mxu0 %v179_v9 }
  0x16   :  { %168 = vmatmul.mubr.msk.bf16.vlgmr.msra.gmra.mxu0 %vm70_vm2, %v180_v10 }
  0x7e   :  { %v31_v11 = vpop.permute.xlu0 %30 }
  0x82   :  { %v36_v16 = vpop.permute.xlu0 %35 }
  0xd6   :  { %v112_v12 = vpop.f32.mrf.mxu0 }
  0xd7   :  { %v113_v13 = vadd.f32 %v112_v12, %v31_v11 }
  0xd8   :  { %v169_v14 = vpop.f32.mrf.mxu0 }
  0xd9   :  { %vm119_vm3 = vcmp.ge.f32.partialorder %v113_v13, 0.0  ;;  %v121_v15 = vmul.f32 0.01, %v113_v13 }
  0xda   :  { %v115_v17 = vpop.f32.mrf.mxu0 }
  0xdb   :  { %v123_v18 = vsel %vm119_vm3, %v113_v13, %v121_v15  ;;  %v116_v19 = vadd.f32 %v115_v17, %v36_v16 }
  0xdc   :  { %v149_v20 = vpack.c.bf16 %v123_v18, %v123_v18  ;;  %v170_v21 = vpop.f32.mrf.mxu0 }
  0xdd   :  { %vm120_vm5 = vcmp.ge.f32.partialorder %v116_v19, 0.0  ;;  %v122_v22 = vmul.f32 0.01, %v116_v19 }
  0xde   :  { %134 = vst.msk [vmem:[%s237_s3] sm:$0xf] %vm133_vm4, %v149_v20 }
  0xdf   :  { %v124_v23 = vsel %vm120_vm5, %v116_v19, %v122_v22 }
  0xe0   :  { %v150_v24 = vpack.c.bf16 %v124_v23, %v124_v23 }
  0xe2   :  { %135 = vst.msk [vmem:[%s237_s3 + $0x4] sm:$0xf] %vm133_vm4, %v150_v24 }

// kernel: vae_forward.7
= control target key start
LH: loop header
LB: loop body
LE: loop exit
PB: predicated region body
PF: predicated region fallthrough
CT: control target
= control target key end

     0   :  { %19 = vsyncpa [#allocation3], 0  ;;  %s911_s0 = inlined_call_operand.vmem [shape: f32[2,256], index: 0, kind: input, shape index: {}]   ;;  %s912_s1 = inlined_call_operand.vmem [shape: f32[2,16], index: 1, kind: input, shape index: {}]   ;;  %s913_s2 = inlined_call_operand.vmem [shape: f32[256,32], index: 2, kind: input, shape index: {}]   ;;  %s914_s3 = inlined_call_operand.vmem [shape: f32[1,32], index: 3, kind: input, shape index: {}]   ;;  %s915_s4 = inlined_call_operand.vmem [shape: f32[32,32], index: 4, kind: input, shape index: {}]   ;;  %s916_s5 = inlined_call_operand.vmem [shape: f32[1,32], index: 5, kind: input, shape index: {}]   ;;  %s917_s6 = inlined_call_operand.vmem [shape: f32[16,32], index: 6, kind: input, shape index: {}]   ;;  %s918_s7 = inlined_call_operand.vmem [shape: f32[1,32], index: 7, kind: input, shape index: {}]   ;;  %s919_s8 = inlined_call_operand.vmem [shape: f32[32,256], index: 8, kind: input, shape index: {}]   ;;  %s920_s9 = inlined_call_operand.vmem [shape: f32[1,256], index: 9, kind: input, shape index: {}]   ;;  %s921_s10 = inlined_call_operand.hbm [shape: f32[2,16], index: 10, kind: output, shape index: {0}]   ;;  %s922_s11 = inlined_call_operand.hbm [shape: f32[2,16], index: 11, kind: output, shape index: {1}]   ;;  %s923_s12 = inlined_call_operand.hbm [shape: f32[2,16], index: 12, kind: output, shape index: {2}]   ;;  %s924_s13 = inlined_call_operand.vmem [shape: f32[2,256], index: 13, kind: output, shape index: {3}]  }
   0x1   :  { %v73_v0 = vld [vmem:[%s913_s2 + $0xf8] sm:$0xff]  ;;  %v72_v2 = vld [vmem:[%s913_s2 + $0xf0] sm:$0xff]  ;;  %v71_v4 = vld [vmem:[%s913_s2 + $0xe8] sm:$0xff] }
   0x2   :  { %v57_v1 = vld [vmem:[%s913_s2 + $0x78] sm:$0xff]  ;;  %525 = vmatprep.subr.mxu0 %v73_v0  ;;  %v56_v3 = vld [vmem:[%s913_s2 + $0x70] sm:$0xff]  ;;  %v55_v5 = vld [vmem:[%s913_s2 + $0x68] sm:$0xff] }
   0x3   :  { %526 = vmatpush3.msra.mxu0 %v57_v1  ;;  %v70_v6 = vld [vmem:[%s913_s2 + $0xe0] sm:$0xff]  ;;  %v69_v8 = vld [vmem:[%s913_s2 + $0xd8] sm:$0xff]  ;;  %v68_v10 = vld [vmem:[%s913_s2 + $0xd0] sm:$0xff] }
   0x4   :  { %527 = vmatprep.subr.mxu0 %v72_v2  ;;  %v54_v7 = vld [vmem:[%s913_s2 + $0x60] sm:$0xff]  ;;  %v53_v9 = vld [vmem:[%s913_s2 + $0x58] sm:$0xff]  ;;  %v52_v11 = vld [vmem:[%s913_s2 + $0x50] sm:$0xff] }
   0x5   :  { %528 = vmatpush3.msra.mxu0 %v56_v3  ;;  %v67_v12 = vld [vmem:[%s913_s2 + $0xc8] sm:$0xff]  ;;  %v518_v13 = vld.sshfl [vmem:[%s911_s0] sm:$0x33 pattern:$0x76325410] }
   0x6   :  { %529 = vmatprep.subr.mxu0 %v71_v4  ;;  %v51_v14 = vld [vmem:[%s913_s2 + $0x48] sm:$0xff]  ;;  %v89_v15 = vcombine.high %v518_v13, %v518_v13 }
   0x7   :  { %530 = vmatpush3.msra.mxu0 %v55_v5 }
   0x8   :  { %531 = vmatprep.subr.mxu0 %v70_v6 }
   0x9   :  { %532 = vmatpush3.msra.mxu0 %v54_v7 }
   0xa   :  { %533 = vmatprep.subr.mxu0 %v69_v8 }
   0xb   :  { %534 = vmatpush3.msra.mxu0 %v53_v9 }
   0xc   :  { %535 = vmatprep.subr.mxu0 %v68_v10 }
   0xd   :  { %20 = vsyncpa [#allocation5], 0  ;;  %536 = vmatpush3.msra.mxu0 %v52_v11  ;;  %v66_v16 = vld [vmem:[%s913_s2 + $0xc0] sm:$0xff]  ;;  %156 = vmatprep.mubr.f32.mxu0 %v89_v15  ;;  %v65_v18 = vld [vmem:[%s913_s2 + $0xb8] sm:$0xff]  ;;  %v659_v34 = vmov 0.0   ;;  %vm660_vm0 = vmmov 0  }
   0xe   :  { %537 = vmatprep.subr.mxu0 %v67_v12  ;;  %v50_v17 = vld [vmem:[%s913_s2 + $0x40] sm:$0xff]  ;;  %v49_v19 = vld [vmem:[%s913_s2 + $0x38] sm:$0xff]  ;;  %v64_v20 = vld [vmem:[%s913_s2 + $0xb0] sm:$0xff]  ;;  %568 = vmatprep.subr.mxu1 %v659_v34  ;;  %s661_s29 = smov 16   ;;  %vm176_vm2 = vcmask 261120   ;;  %vm452_vm3 = vcmask 123904  }
   0xf   :  { %538 = vmatpush3.msra.mxu0 %v51_v14  ;;  %v48_v21 = vld [vmem:[%s913_s2 + $0x30] sm:$0xff]  ;;  %v63_v22 = vld [vmem:[%s913_s2 + $0xa8] sm:$0xff]  ;;  %v62_v24 = vld [vmem:[%s913_s2 + $0xa0] sm:$0xff]  ;;  %576 = vmatprep.mubr.msk.f32.mxu1 %vm660_vm0, %v659_v34  ;;  %vm276_vm4 = vcmask 130048   ;;  %s664_s16 = smov [#allocation2]  }
  0x10   :  { %539 = vmatprep.subr.mxu0 %v66_v16  ;;  %v47_v23 = vld [vmem:[%s913_s2 + $0x28] sm:$0xff]  ;;  %v46_v25 = vld [vmem:[%s913_s2 + $0x20] sm:$0xff]  ;;  %v61_v26 = vld [vmem:[%s913_s2 + $0x98] sm:$0xff] }
  0x11   :  { %540 = vmatpush3.msra.mxu0 %v50_v17  ;;  %v45_v27 = vld [vmem:[%s913_s2 + $0x18] sm:$0xff]  ;;  %v60_v28 = vld [vmem:[%s913_s2 + $0x90] sm:$0xff]  ;;  %v59_v30 = vld [vmem:[%s913_s2 + $0x88] sm:$0xff] }
  0x12   :  { %541 = vmatprep.subr.mxu0 %v65_v18  ;;  %v44_v29 = vld [vmem:[%s913_s2 + $0x10] sm:$0xff]  ;;  %v43_v31 = vld [vmem:[%s913_s2 + $0x8] sm:$0xff]  ;;  %v58_v32 = vld [vmem:[%s913_s2 + $0x80] sm:$0xff] }
  0x13   :  { %542 = vmatpush3.msra.mxu0 %v49_v19  ;;  %v42_v33 = vld [vmem:[%s913_s2] sm:$0xff]  ;;  %v168_v35 = vld [vmem:[%s915_s4 + $0x18] sm:$0xff]  ;;  %v167_v36 = vld [vmem:[%s915_s4 + $0x10] sm:$0xff] }
  0x14   :  { %543 = vmatprep.subr.mxu0 %v64_v20  ;;  %569 = vmatpush3.msra.mxu1 %v168_v35  ;;  %v166_v37 = vld [vmem:[%s915_s4 + $0x8] sm:$0xff]  ;;  %v165_v38 = vld [vmem:[%s915_s4] sm:$0xff]  ;;  %v359_v55 = vld [vmem:[%s919_s8 + $0x38] sm:$0xff]  ;;  %s663_s4 = smov [#allocation4]  }
  0x15   :  { %544 = vmatpush3.msra.mxu0 %v48_v21  ;;  %570 = vmatprep.subr.mxu1 %v659_v34  ;;  %v253_v39 = vld [vmem:[%s912_s1] sm:$0x3]  ;;  %v265_v47 = vld [vmem:[%s917_s6 + $0x8] sm:$0xff]  ;;  %v358_v61 = vld [vmem:[%s919_s8 + $0x30] sm:$0xff]  ;;  %s488_s15 = sshll.u32 %s663_s4, 4  ;;  %s489_s15 = int_to_ptr.vmem [resolvable:$true] %s488_s15 }
  0x16   :  { %545 = vmatprep.subr.mxu0 %v63_v22  ;;  %571 = vmatpush3.msra.mxu1 %v167_v36  ;;  %v517_v41 = vld [vmem:[%s914_s3] ss:$0 sm:$0xff]  ;;  %v357_v0 = vld [vmem:[%s919_s8 + $0x28] sm:$0xff]  ;;  %v355_v2 = vld [vmem:[%s919_s8 + $0x18] sm:$0xff]  ;;  %s478_s3 = sshll.u32 %s664_s16, 4  ;;  %s595_s17 = scalar_lea.vmem %s489_s15, 32  ;;  %s479_s3 = int_to_ptr.vmem [resolvable:$true] %s478_s3 }
  0x17   :  { %546 = vmatpush3.msra.mxu0 %v47_v23  ;;  %572 = vmatprep.subr.mxu1 %v659_v34  ;;  %v264_v48 = vld [vmem:[%s917_s6] sm:$0xff]  ;;  %v354_v3 = vld [vmem:[%s919_s8 + $0x10] sm:$0xff]  ;;  %v353_v4 = vld [vmem:[%s919_s8 + $0x8] sm:$0xff]  ;;  %p596_p0 = scmp.ne.s32.totalorder %s489_s15, %s595_s17  ;;  %p600_p1 = scmp.lt.s32.totalorder %s489_s15, %s489_s15 }
  0x18   :  { %547 = vmatprep.subr.mxu0 %v62_v24  ;;  %573 = vmatpush3.msra.mxu1 %v166_v37  ;;  %v519_v49 = vld [vmem:[%s916_s5] ss:$0 sm:$0xff]  ;;  %s662_s5 = smov 112   ;;  %p601_p2 = scmp.lt.s32.totalorder %s595_s17, %s595_s17 }
  0x19   :  { %548 = vmatpush3.msra.mxu0 %v46_v25  ;;  %574 = vmatprep.subr.mxu1 %v659_v34  ;;  %v356_v1 = vld [vmem:[%s919_s8 + $0x20] sm:$0xff] }
  0x1a   :  { %549 = vmatprep.subr.mxu0 %v61_v26  ;;  %575 = vmatpush3.msra.mxu1 %v165_v38  ;;  %v352_v5 = vld [vmem:[%s919_s8] sm:$0xff]  ;;  %p602_p3 = por %p601_p2, %p600_p1 }
  0x1b   :  { %550 = vmatpush3.msra.mxu0 %v45_v27  ;;  %579 = vmatprep.subr.mxu1 %v659_v34  ;;  %v521_v6 = vld [vmem:[%s918_s7] ss:$0 sm:$0xff] }
  0x1c   :  { %551 = vmatprep.subr.mxu0 %v60_v28  ;;  %255 = vrot.lane.b32.xlu0 %v253_v39, %s661_s29  ;;  %p603_p4 = pnand %p602_p3, %p596_p0 }
  0x1d   :  { %552 = vmatpush3.msra.mxu0 %v44_v29 }
  0x1e   :  { %553 = vmatprep.subr.mxu0 %v59_v30 }
  0x1f   :  { %554 = vmatpush3.msra.mxu0 %v43_v31 }
  0x20   :  { %555 = vmatprep.subr.mxu0 %v58_v32 }
  0x21   :  { %556 = vmatpush3.msra.mxu0 %v42_v33 }
  0x22   :  { %157 = vmatmul.mubr.f32.vlgmr.msra.gmra.mxu0 %v518_v13 }
  0x8e   :  { %v256_v57 = vpop.permute.xlu0 %255 }
  0xe2   :  { %v557_v40 = vpop.f32.mrf.mxu0 }
  0xe4   :  { %v558_v42 = vpop.f32.mrf.mxu0 }
  0xe5   :  { %v559_v43 = vadd.f32 %v558_v42, %v557_v40 }
  0xe7   :  { %v159_v44 = vadd.f32 %v559_v43, %v517_v41 }
  0xe9   :  { %v163_v45 = vmul.f32 0.01, %v159_v44  ;;  %vm162_vm1 = vcmp.ge.f32.partialorder %v159_v44, 0.0 }
  0xeb   :  { %v164_v46 = vsel %vm162_vm1, %v159_v44, %v163_v45 }
  0xec   :  { %577 = vmatmul.mubr.msk.f32.vlgmr.msra.gmra.mxu1 %vm176_vm2, %v164_v46 }
  0xed   :  { %583 = vmatprep.mubr.msk.f32.mxu1 %vm660_vm0, %v659_v34  ;;  %580 = vmatpush3.msra.mxu1 %v265_v47 }
  0xee   :  { %581 = vmatprep.subr.mxu1 %v659_v34 }
  0xef   :  { %582 = vmatpush3.msra.mxu1 %v264_v48 }
  0xf0   :  { %399 = vmatprep.subr.mxu1 %v359_v55 }
 0x1ac   :  { %v246_v50 = vpop.f32.mrf.mxu1 }
 0x1ad   :  { %v247_v51 = vadd.f32 %v519_v49, %v246_v50 }
 0x1ae   :  { %v578_v52 = vpop.f32.mrf.mxu1 }
 0x1af   :  { %260 = vrot.lane.b32.xlu0 %v247_v51, %s661_s29  ;;  %453 = vst.msk [vmem:[#allocation2] sm:$0x3] %vm452_vm3, %v247_v51  ;;  %v250_v53 = vmul.f32 0.5, %v247_v51 }
 0x1b1   :  { %v251_v54 = vmul.f32 1.442695, %v250_v53 }
 0x1b3   :  { %593 = vpow2.f32 %v251_v54 }
 0x1c0   :  { %v594_v56 = vpop.eup %593 }
 0x1c1   :  { %v258_v58 = vmul.f32 %v594_v56, %v256_v57 }
 0x221   :  { %v261_v59 = vpop.permute.xlu0 %260 }
 0x222   :  { %v263_v60 = vadd.f32 %v261_v59, %v258_v58 }
 0x224   :  { %274 = vrot.lane.b32.xlu1 %v263_v60, %s662_s5 }
 0x228   :  { %454 = vrot.lane.b32.xlu1 %v247_v51, %s662_s5 }
 0x296   :  { %v275_v62 = vpop.permute.xlu1 %274 }
 0x297   :  { %584 = vmatmul.mubr.msk.f32.vlgmr.msra.gmra.mxu1 %vm276_vm4, %v275_v62  ;;  %459 = vst.msk [vmem:[#allocation6] sm:$0x3] %vm452_vm3, %v275_v62 }
 0x298   :  { %400 = vmatpush1.msra.mxu1 %v358_v61  ;;  %439 = vmatprep.mubr.f32.mxu1 %v659_v34 }
 0x299   :  { %401 = vmatprep.subr.mxu1 %v357_v0 }
 0x29a   :  { %v455_v63 = vpop.permute.xlu1 %454  ;;  %402 = vmatpush1.msra.mxu1 %v356_v1 }
 0x29b   :  { %457 = vst.msk [vmem:[#allocation4] sm:$0x3] %vm452_vm3, %v455_v63  ;;  %403 = vmatprep.subr.mxu1 %v355_v2 }
 0x29c   :  { %404 = vmatpush1.msra.mxu1 %v354_v3 }
 0x29d   :  { %405 = vmatprep.subr.mxu1 %v353_v4 }
 0x29e   :  { %406 = vmatpush1.msra.mxu1 %v352_v5 }
 0x357   :  { %v345_v7 = vpop.f32.mrf.mxu1 }
 0x358   :  { %v346_v8 = vadd.f32 %v521_v6, %v345_v7 }
 0x359   :  { %v585_v9 = vpop.f32.mrf.mxu1 }
 0x35a   :  { %vm349_vm5 = vcmp.ge.f32.partialorder %v346_v8, 0.0  ;;  %v350_v10 = vmul.f32 0.01, %v346_v8 }
 0x35c   :  { %v351_v11 = vsel %vm349_vm5, %v346_v8, %v350_v10 }
 0x35d   :  { %523 = vmatmul.mubr.msk.f32.vlgmr.msra.gmra.mxu1 %vm176_vm2, %v351_v11 }
 0x35e   :  { %606 = shalt.err (!%p603_p4)
}
 0x35f   :  { %491 = dma.vmem_to_hbm [thread:$0]  %s489_s15, 32, %s922_s11, [#allocation5]  }
 0x360   :  { %s615_s18 = scalar_lea.vmem %s479_s3, 32  ;;  %p620_p6 = scmp.lt.s32.totalorder %s479_s3, %s479_s3 }
 0x361   :  { %p616_p5 = scmp.ne.s32.totalorder %s479_s3, %s615_s18  ;;  %p621_p7 = scmp.lt.s32.totalorder %s615_s18, %s615_s18 }
 0x363   :  { %p622_p8 = por %p621_p7, %p620_p6 }
 0x365   :  { %p623_p9 = pnand %p622_p8, %p616_p5 }
 0x367   :  { %626 = shalt.err (!%p623_p9)
}
 0x368   :  { %481 = dma.vmem_to_hbm [thread:$0]  %s479_s3, 32, %s921_s10, [#allocation3]  }
 0x369   :  { %s665_s6 = smov [#allocation6]  }
 0x36a   :  { %s498_s20 = sshll.u32 %s665_s6, 4  ;;  %s499_s20 = int_to_ptr.vmem [resolvable:$true] %s498_s20 }
 0x36b   :  { %s635_s21 = scalar_lea.vmem %s499_s20, 32  ;;  %p640_p11 = scmp.lt.s32.totalorder %s499_s20, %s499_s20 }
 0x36c   :  { %p636_p10 = scmp.ne.s32.totalorder %s499_s20, %s635_s21  ;;  %p641_p12 = scmp.lt.s32.totalorder %s635_s21, %s635_s21 }
 0x36e   :  { %p642_p13 = por %p641_p12, %p640_p11 }
 0x370   :  { %p643_p0 = pnand %p642_p13, %p636_p10 }
 0x372   :  { %646 = shalt.err (!%p643_p0)
}
 0x373   :  { %501 = dma.vmem_to_hbm [thread:$0]  %s499_s20, 32, %s923_s12, [#allocation5]   ;;  %v362_v12 = vlaneseq  ;;  %v360_v15 = vld [vmem:[%s920_s9] sm:$0x3] }
 0x375   :  { %v363_v13 = vshrl.u32 %v362_v12, 7 }
 0x377   :  { %v364_v14 = vsub.s32 0, %v363_v13  ;;  %v368_v16 = vsub.s32 1, %v363_v13 }
 0x379   :  { %v365_v17 = vrot.slane %v360_v15, %v364_v14  ;;  %v369_v18 = vrot.slane %v360_v15, %v368_v16 }
 0x41d   :  { %v441_v19 = vpop.f32.mrf.mxu1 }
 0x41e   :  { %v442_v20 = vadd.f32 %v441_v19, %v365_v17 }
 0x41f   :  { %v443_v21 = vpop.f32.mrf.mxu1 }
 0x420   :  { %v448_v22 = vmul.f32 0.01, %v442_v20  ;;  %v444_v23 = vadd.f32 %v443_v21, %v369_v18  ;;  %vm446_vm6 = vcmp.ge.f32.partialorder %v442_v20, 0.0 }
 0x422   :  { %vm447_vm7 = vcmp.ge.f32.partialorder %v444_v23, 0.0  ;;  %v449_v24 = vmul.f32 0.01, %v444_v23  ;;  %v450_v25 = vsel %vm446_vm6, %v442_v20, %v448_v22 }
 0x424   :  { %v451_v26 = vsel %vm447_vm7, %v444_v23, %v449_v24 }
 0x425   :  { %v462_v27 = vcombine.low %v450_v25, %v451_v26 }
 0x427   :  { %524 = vst.sshfl [vmem:[%s924_s13] sm:$0x33 pattern:$0x76325410] %v462_v27 }
 0x428   :  { %655 = dma.done.wait [#allocation3], 32  }
 0x429   :  { %656 = vsyncadd [#allocation3], 4294967264 }
 0x42a   :  { %657 = dma.done.wait [#allocation5], 64  }
 0x42b   :  { %658 = vsyncadd [#allocation5], 4294967232 }
 0x42c   :  { %515 = vsyncpa [#allocation3], 1 }
 0x42d   :  { %516 = vsyncpa [#allocation5], 1 }

// kernel: vae_forward.8
= control target key start
LH: loop header
LB: loop body
LE: loop exit
PB: predicated region body
PF: predicated region fallthrough
CT: control target
= control target key end

     0   :  { %v178_v0 = vmov 0   ;;  %vm100_vm0 = vcmask 130048   ;;  %s235_s1 = inlined_call_operand.vmem [shape: bf16[144,128], index: 1, kind: input, shape index: {}]   ;;  %s236_s0 = inlined_call_operand.vmem [shape: bf16[8,144], index: 0, kind: input, shape index: {}]   ;;  %s237_s2 = inlined_call_operand.vmem [shape: f32[8,1], index: 2, kind: input, shape index: {}]   ;;  %s238_s3 = inlined_call_operand.vmem [shape: bf16[8,128], index: 3, kind: output, shape index: {}]  }
   0x1   :  { %104 = vmatprep.subr.bf16.mxu0 %v178_v0  ;;  %v167_v1 = vld [vmem:[%s235_s1 + $0x38] sm:$0xff]   ;;  %166 = vset.pattern.permute.xlu0 %v178_v0  ;;  %v168_v2 = vld [vmem:[%s235_s1 + $0x30] sm:$0xff]   ;;  %v169_v3 = vld [vmem:[%s235_s1 + $0x28] sm:$0xff]  }
   0x2   :  { %105 = vmatpush1.bf16.msra.mxu0 %v167_v1  ;;  %v15_v4 = vld [vmem:[%s236_s0] sm:$0xff]  ;;  %v171_v8 = vld [vmem:[%s235_s1 + $0x18] sm:$0xff]   ;;  %v172_v9 = vld [vmem:[%s235_s1 + $0x10] sm:$0xff]  }
   0x3   :  { %106 = vmatprep.subr.bf16.mxu0 %v178_v0  ;;  %v34_v5 = vld [vmem:[%s237_s2] sm:$0xff]  ;;  %v154_v7 = vcombine.high %v15_v4, %v15_v4  ;;  %v173_v10 = vld [vmem:[%s235_s1 + $0x8] sm:$0xff]   ;;  %v153_v13 = vcombine.low %v15_v4, %v15_v4 }
   0x4   :  { %v170_v6 = vld [vmem:[%s235_s1 + $0x20] sm:$0xff]   ;;  %37 = vperm.xlu0 %166, %v34_v5  }
   0x5   :  { %164 = vmatprep.mubr.msk.bf16.mxu0 %vm100_vm0, %v154_v7  ;;  %v174_v11 = vld [vmem:[%s235_s1] sm:$0xff]  }
   0x6   :  { %107 = vmatpush1.bf16.msra.mxu0 %v168_v2  ;;  %v175_v12 = vld [vmem:[%s235_s1 + $0x40] sm:$0xff]  }
   0x7   :  { %108 = vmatprep.subr.bf16.mxu0 %v178_v0 }
   0xa   :  { %109 = vmatpush1.bf16.msra.mxu0 %v169_v3 }
   0xb   :  { %110 = vmatprep.subr.bf16.mxu0 %v178_v0 }
   0xe   :  { %111 = vmatpush1.bf16.msra.mxu0 %v170_v6 }
   0xf   :  { %112 = vmatprep.subr.bf16.mxu0 %v178_v0 }
  0x12   :  { %113 = vmatpush1.bf16.msra.mxu0 %v171_v8 }
  0x13   :  { %114 = vmatprep.subr.bf16.mxu0 %v178_v0 }
  0x16   :  { %115 = vmatpush1.bf16.msra.mxu0 %v172_v9 }
  0x17   :  { %116 = vmatprep.subr.bf16.mxu0 %v178_v0 }
  0x1a   :  { %117 = vmatpush1.bf16.msra.mxu0 %v173_v10 }
  0x1b   :  { %118 = vmatprep.subr.bf16.mxu0 %v178_v0 }
  0x1e   :  { %119 = vmatpush1.bf16.msra.mxu0 %v174_v11 }
  0x1f   :  { %134 = vmatprep.subr.bf16.mxu0 %v178_v0 }
  0x22   :  { %135 = vmatpush2.bf16.msra.mxu0 %v175_v12 }
  0x25   :  { %137 = vmatmul.mubr.bf16.vlgmr.msra.gmra.mxu0 %v153_v13 }
  0x7f   :  { %v38_v14 = vpop.permute.xlu0 %37 }
  0xe5   :  { %v138_v15 = vpop.f32.mrf.mxu0 }
  0xe6   :  { %v139_v16 = vadd.f32 %v138_v15, %v38_v14 }
  0xe7   :  { %v140_v17 = vpop.f32.mrf.mxu0 }
  0xe8   :  { %vm144_vm1 = vcmp.ge.f32.partialorder %v139_v16, 0.0  ;;  %v145_v18 = vmul.f32 0.01, %v139_v16 }
  0xe9   :  { %v141_v19 = vpop.f32.mrf.mxu0 }
  0xea   :  { %v146_v20 = vsel %vm144_vm1, %v139_v16, %v145_v18 }
  0xeb   :  { %v147_v21 = vpack.c.bf16 %v146_v20, %v146_v20  ;;  %v142_v22 = vpop.f32.mrf.mxu0 }
  0xed   :  { %148 = vst [vmem:[%s238_s3] sm:$0xf] %v147_v21 }

// kernel: vae_forward.9
= control target key start
LH: loop header
LB: loop body
LE: loop exit
PB: predicated region body
PF: predicated region fallthrough
CT: control target
= control target key end

     0   :  { %vm134_vm0 = vcmask 1043456   ;;  %v341_v2 = vmov 0   ;;  %vm130_vm1 = vcmask 588800   ;;  %s428_s1 = inlined_call_operand.vmem [shape: bf16[72,512], index: 1, kind: input, shape index: {}]   ;;  %s429_s2 = inlined_call_operand.vmem [shape: f32[4,1], index: 2, kind: input, shape index: {}]   ;;  %s430_s0 = inlined_call_operand.vmem [shape: bf16[4,72], index: 0, kind: input, shape index: {}]   ;;  %s431_s3 = inlined_call_operand.vmem [shape: f32[4,512], index: 3, kind: output, shape index: {}]  }
   0x1   :  { %v32_v0 = vld [vmem:[%s428_s1 + $0x80] sm:$0xff]  ;;  %v33_v1 = vld [vmem:[%s428_s1 + $0x88] sm:$0xff]  ;;  %179 = vmatprep.mubr.bf16.mxu0 %v341_v2  ;;  %220 = vmatprep.mubr.bf16.mxu1 %v341_v2 }
   0x2   :  { %v284_v3 = vcombine.high %v32_v0, %v32_v0  ;;  %v286_v4 = vcombine.high %v33_v1, %v33_v1  ;;  %v283_v5 = vcombine.low %v32_v0, %v32_v0  ;;  %v285_v6 = vcombine.low %v33_v1, %v33_v1  ;;  %v301_v7 = vld [vmem:[%s428_s1 + $0x64] ss:$16 sps:$4 sm:$0xff]   ;;  %296 = vset.pattern.permute.xlu0 %v341_v2  ;;  %v303_v8 = vld [vmem:[%s428_s1 + $0x6c] ss:$16 sps:$4 sm:$0xff]   ;;  %v305_v11 = vld [vmem:[%s428_s1 + $0x60] ss:$16 sps:$4 sm:$0xff]  }
   0x3   :  { %v306_v12 = vld [vmem:[%s428_s1 + $0x68] ss:$16 sps:$4 sm:$0xff]   ;;  %v307_v13 = vld [vmem:[%s428_s1 + $0x44] ss:$16 sps:$4 sm:$0xff]   ;;  %v309_v14 = vld [vmem:[%s428_s1 + $0x4c] ss:$16 sps:$4 sm:$0xff]  }
   0x4   :  { %287 = vmatprep.subr.msk.bf16.mxu0 %vm134_vm0, %v284_v3  ;;  %289 = vmatprep.subr.msk.bf16.mxu1 %vm134_vm0, %v286_v4  ;;  %v136_v9 = vsel %vm134_vm0, %v283_v5, 0  ;;  %v142_v10 = vsel %vm134_vm0, %v285_v6, 0  ;;  %v311_v15 = vld [vmem:[%s428_s1 + $0x40] ss:$16 sps:$4 sm:$0xff]   ;;  %v312_v16 = vld [vmem:[%s428_s1 + $0x48] ss:$16 sps:$4 sm:$0xff]  }
   0x5   :  { %154 = vmatpush1.bf16.msra.mxu0 %v136_v9  ;;  %195 = vmatpush1.bf16.msra.mxu1 %v142_v10  ;;  %v313_v17 = vld [vmem:[%s428_s1 + $0x24] ss:$16 sps:$4 sm:$0xff]   ;;  %v315_v18 = vld [vmem:[%s428_s1 + $0x2c] ss:$16 sps:$4 sm:$0xff]   ;;  %v34_v19 = vld [vmem:[%s429_s2] sm:$0xf] }
   0x6   :  { %155 = vmatprep.subr.bf16.mxu0 %v301_v7  ;;  %196 = vmatprep.subr.bf16.mxu1 %v303_v8  ;;  %v317_v20 = vld [vmem:[%s428_s1 + $0x20] ss:$16 sps:$4 sm:$0xff]   ;;  %v318_v21 = vld [vmem:[%s428_s1 + $0x28] ss:$16 sps:$4 sm:$0xff]   ;;  %v319_v22 = vld [vmem:[%s428_s1 + $0x4] ss:$16 sps:$4 sm:$0xff]  }
   0x7   :  { %v321_v23 = vld [vmem:[%s428_s1 + $0xc] ss:$16 sps:$4 sm:$0xff]   ;;  %37 = vperm.xlu0 %296, %v34_v19   ;;  %v323_v24 = vld [vmem:[%s428_s1] ss:$16 sps:$4 sm:$0xff]   ;;  %v324_v25 = vld [vmem:[%s428_s1 + $0x8] ss:$16 sps:$4 sm:$0xff]  }
   0x8   :  { %v15_v26 = vld [vmem:[%s430_s0] sm:$0x3] }
   0x9   :  { %156 = vmatpush1.bf16.msra.mxu0 %v305_v11  ;;  %197 = vmatpush1.bf16.msra.mxu1 %v306_v12 }
   0xa   :  { %157 = vmatprep.subr.bf16.mxu0 %v307_v13  ;;  %198 = vmatprep.subr.bf16.mxu1 %v309_v14 }
   0xd   :  { %158 = vmatpush1.bf16.msra.mxu0 %v311_v15  ;;  %199 = vmatpush1.bf16.msra.mxu1 %v312_v16 }
   0xe   :  { %159 = vmatprep.subr.bf16.mxu0 %v313_v17  ;;  %200 = vmatprep.subr.bf16.mxu1 %v315_v18 }
  0x11   :  { %160 = vmatpush1.bf16.msra.mxu0 %v317_v20  ;;  %201 = vmatpush1.bf16.msra.mxu1 %v318_v21 }
  0x12   :  { %161 = vmatprep.subr.bf16.mxu0 %v319_v22  ;;  %202 = vmatprep.subr.bf16.mxu1 %v321_v23 }
  0x15   :  { %162 = vmatpush1.bf16.msra.mxu0 %v323_v24  ;;  %203 = vmatpush1.bf16.msra.mxu1 %v324_v25 }
  0x18   :  { %288 = vmatmul.mubr.msk.bf16.vlgmr.msra.gmra.mxu0 %vm130_vm1, %v15_v26  ;;  %290 = vmatmul.mubr.msk.bf16.vlgmr.msra.gmra.mxu1 %vm130_vm1, %v15_v26 }
  0x82   :  { %v38_v27 = vpop.permute.xlu0 %37 }
  0xd8   :  { %v181_v28 = vpop.f32.mrf.mxu0  ;;  %v222_v29 = vpop.f32.mrf.mxu1 }
  0xd9   :  { %v182_v30 = vadd.f32 %v181_v28, %v38_v27  ;;  %v223_v31 = vadd.f32 %v222_v29, %v38_v27 }
  0xda   :  { %v183_v32 = vpop.f32.mrf.mxu0  ;;  %v224_v33 = vpop.f32.mrf.mxu1 }
  0xdb   :  { %v291_v34 = vmul.f32 -1.442695, %v182_v30  ;;  %v293_v35 = vmul.f32 -1.442695, %v223_v31  ;;  %v184_v36 = vadd.f32 %v183_v32, %v38_v27  ;;  %v225_v37 = vadd.f32 %v224_v33, %v38_v27 }
  0xdc   :  { %v185_v38 = vpop.f32.mrf.mxu0  ;;  %v226_v39 = vpop.f32.mrf.mxu1 }
  0xdd   :  { %325 = vpow2.f32 %v291_v34  ;;  %v292_v40 = vmul.f32 -1.442695, %v184_v36  ;;  %v294_v41 = vmul.f32 -1.442695, %v225_v37 }
  0xde   :  { %327 = vpow2.f32 %v293_v35  ;;  %v186_v42 = vpop.f32.mrf.mxu0  ;;  %v227_v43 = vpop.f32.mrf.mxu1 }
  0xdf   :  { %329 = vpow2.f32 %v292_v40 }
  0xe0   :  { %331 = vpow2.f32 %v294_v41 }
  0xea   :  { %v326_v44 = vpop.eup %325 }
  0xeb   :  { %v328_v45 = vpop.eup %327  ;;  %v241_v46 = vadd.f32 1.0, %v326_v44 }
  0xec   :  { %v330_v47 = vpop.eup %329  ;;  %v243_v48 = vadd.f32 1.0, %v328_v45 }
  0xed   :  { %v332_v49 = vpop.eup %331  ;;  %333 = vrcp.f32 %v241_v46  ;;  %v242_v50 = vadd.f32 1.0, %v330_v47 }
  0xee   :  { %335 = vrcp.f32 %v243_v48  ;;  %v244_v51 = vadd.f32 1.0, %v332_v49 }
  0xef   :  { %337 = vrcp.f32 %v242_v50 }
  0xf0   :  { %339 = vrcp.f32 %v244_v51 }
  0xfa   :  { %v334_v52 = vpop.eup %333 }
  0xfb   :  { %v336_v53 = vpop.eup %335 }
  0xfc   :  { %v338_v54 = vpop.eup %337 }
  0xfd   :  { %v340_v55 = vpop.eup %339  ;;  %v257_v56 = vcombine.low %v334_v52, %v338_v54 }
  0xfe   :  { %v258_v57 = vcombine.low %v336_v53, %v340_v55 }
  0xff   :  { %261 = vst [vmem:[%s431_s3] sm:$0xff] %v257_v56 }
 0x100   :  { %262 = vst [vmem:[%s431_s3 + $0x8] sm:$0xff] %v258_v57 }

</bundles_post_ra>
